<compile_context>
chip_gen: v5e
topology: v5e:2x2
jax: 0.10.0
libtpu: 0.0.40
codegen_flags: <defaults>
</compile_context>

<pallas_src>
import functools

import jax
import jax.numpy as jnp
import numpy as np
from jax.experimental import pallas as pl
from jax.experimental.pallas import tpu as pltpu


def _mixup_fused_kernel(perm_ref, coeffs_ref,
                        x_ref, xp_ref, y1_ref, y1p_ref, y2_ref, y2p_ref,
                        ox_ref, oy1_ref, oy2_ref):
    """out[i] = c[i]*t[i] + (1-c[i])*t[perm[i]] for t in (X, Y1, Y2); one batch row per step."""
    i = pl.program_id(0)
    c = coeffs_ref[i]                  # scalar f32 read from SMEM
    omc = 1.0 - c
    # Unrolled at trace time over the three (orig, permuted, out) triples.
    for src, psrc, dst in ((x_ref, xp_ref, ox_ref),
                           (y1_ref, y1p_ref, oy1_ref),
                           (y2_ref, y2p_ref, oy2_ref)):
        a = src[...].astype(jnp.float32)    # (1, S, 128) lane-dense tile, row i
        b = psrc[...].astype(jnp.float32)   # (1, S, 128) tile, row perm[i]
        dst[...] = (c * a + omc * b).astype(dst.dtype)
        # TODO(synk): dtype/generation-conditional bf16 fast path (v6e/v7x) to
        # halve vreg pressure when inputs are bf16; kept f32 for exactness here.


def _to_slab(x):
    """Flatten trailing dims and pad to a lane-dense (B, S, 128) slab."""
    bs = x.shape[0]
    feat = int(np.prod(x.shape[1:])) if x.ndim > 1 else 1
    feat_p = ((feat + 127) // 128) * 128
    xf = x.reshape(bs, feat)
    if feat_p != feat:
        xf = jnp.pad(xf, ((0, 0), (0, feat_p - feat)))
    return xf.reshape(bs, feat_p // 128, 128), feat


def _from_slab(slab, orig_shape, feat):
    bs = orig_shape[0]
    return slab.reshape(bs, -1)[:, :feat].reshape(orig_shape)


def multi_mixup(X, Y1, Y2, key, mix_beta=0.5, return_perm=False):
    """JAX/Pallas equivalent of MultiMixup.forward (randomness drawn from `key`)."""
    bs = X.shape[0]
    k_perm, k_beta = jax.random.split(key)
    # torch.randperm(bs)
    perm = jax.random.permutation(k_perm, bs).astype(jnp.int32)
    # Beta(mix_beta, mix_beta).rsample((bs,))
    coeffs = jax.random.beta(k_beta, mix_beta, mix_beta, (bs,)).astype(jnp.float32)

    xs, fx = _to_slab(X)
    y1s, f1 = _to_slab(Y1)
    y2s, f2 = _to_slab(Y2)

    # index_maps receive (grid idx, *prefetch_refs); perm lives in SMEM.
    same = lambda i, perm_ref: (i, 0, 0)
    gathered = lambda i, perm_ref: (perm_ref[i], 0, 0)

    def spec(slab, idx_map):
        return pl.BlockSpec((1, slab.shape[1], 128), idx_map)

    # TODO(synk): for very large per-row feature slabs (v7x 64 MiB VMEM), add a
    # second grid axis over the S dimension of X instead of one block per row.
    outs = pl.pallas_call(
        _mixup_fused_kernel,
        out_shape=(jax.ShapeDtypeStruct(xs.shape, X.dtype),
                   jax.ShapeDtypeStruct(y1s.shape, Y1.dtype),
                   jax.ShapeDtypeStruct(y2s.shape, Y2.dtype)),
        grid_spec=pltpu.PrefetchScalarGridSpec(
            num_scalar_prefetch=1,                 # perm -> SMEM, fed to index_maps
            grid=(bs,),
            in_specs=[
                # coeffs: whole (B,) f32 vector resident in SMEM
                pl.BlockSpec(memory_space=pltpu.MemorySpace.SMEM),
                spec(xs, same), spec(xs, gathered),
                spec(y1s, same), spec(y1s, gathered),
                spec(y2s, same), spec(y2s, gathered),
            ],
            out_specs=[spec(xs, same), spec(y1s, same), spec(y2s, same)],
        ),
        compiler_params=pltpu.CompilerParams(
            dimension_semantics=("parallel",),      # rows are independent -> megacore on v7x
            vmem_limit_bytes=64 * 1024 * 1024,
        ),
    )(perm, coeffs, xs, xs, y1s, y1s, y2s, y2s)

    Xm = _from_slab(outs[0], X.shape, fx)
    Y1m = _from_slab(outs[1], Y1.shape, f1)
    Y2m = _from_slab(outs[2], Y2.shape, f2)
    if return_perm:
        return Xm, Y1m, Y2m, perm, coeffs
    return Xm, Y1m, Y2m


def _mix_ref(x, coeffs, perm):
    """Pure-JAX reference (mirrors MultiMixup.mix broadcasting)."""
    c = coeffs.reshape((-1,) + (1,) * (x.ndim - 1)).astype(jnp.float32)
    return (c * x.astype(jnp.float32)
            + (1.0 - c) * x[perm].astype(jnp.float32)).astype(x.dtype)


if __name__ == "__main__":
    key = jax.random.PRNGKey(0)
    kx, ky1, ky2, kmix = jax.random.split(key, 4)

    bs = 8
    # X is NCHW-like (batch, channels, H, W); Y1 is 2-D labels; Y2 is 3-D labels.
    X = jax.random.normal(kx, (bs, 4, 16, 16), dtype=jnp.float32)
    Y1 = jax.random.normal(ky1, (bs, 16), dtype=jnp.float32)
    Y2 = jax.random.normal(ky2, (bs, 8, 32), dtype=jnp.float32)

    Xm, Y1m, Y2m, perm, coeffs = multi_mixup(X, Y1, Y2, kmix,
                                             mix_beta=0.5, return_perm=True)
    jax.block_until_ready((Xm, Y1m, Y2m))

    # Correctness check against the pure-JAX reference.
    np.testing.assert_allclose(np.asarray(Xm), np.asarray(_mix_ref(X, coeffs, perm)),
                               rtol=1e-6, atol=1e-6)
    np.testing.assert_allclose(np.asarray(Y1m), np.asarray(_mix_ref(Y1, coeffs, perm)),
                               rtol=1e-6, atol=1e-6)
    np.testing.assert_allclose(np.asarray(Y2m), np.asarray(_mix_ref(Y2, coeffs, perm)),
                               rtol=1e-6, atol=1e-6)

    print("KERNEL_OK")
</pallas_src>

<mosaic_0001>
module attributes {stable_mosaic.version = 11 : i64} {
  func.func @_mixup_fused_kernel(%arg0: i32, %arg1: memref<8xi32, #tpu.memory_space<smem>>, %arg2: memref<8xf32, #tpu.memory_space<smem>>, %arg3: memref<1x8x128xf32, #tpu.memory_space<vmem>>, %arg4: memref<1x8x128xf32, #tpu.memory_space<vmem>>, %arg5: memref<1x1x128xf32, #tpu.memory_space<vmem>>, %arg6: memref<1x1x128xf32, #tpu.memory_space<vmem>>, %arg7: memref<1x2x128xf32, #tpu.memory_space<vmem>>, %arg8: memref<1x2x128xf32, #tpu.memory_space<vmem>>, %arg9: memref<1x8x128xf32, #tpu.memory_space<vmem>>, %arg10: memref<1x1x128xf32, #tpu.memory_space<vmem>>, %arg11: memref<1x2x128xf32, #tpu.memory_space<vmem>>) attributes {dimension_semantics = [#tpu.dimension_semantics<parallel>], iteration_bounds = array<i64: 8>, scalar_prefetch = 1 : i64, scratch_operands = 0 : i64, tpu.core_type = #tpu.core_type<tc>, window_params = [{transform_indices = @transform_0, window_bounds = array<i64: 8>}, {transform_indices = @transform_1, window_bounds = array<i64: 1, 8, 128>}, {transform_indices = @transform_2, window_bounds = array<i64: 1, 8, 128>}, {transform_indices = @transform_3, window_bounds = array<i64: 1, 1, 128>}, {transform_indices = @transform_4, window_bounds = array<i64: 1, 1, 128>}, {transform_indices = @transform_5, window_bounds = array<i64: 1, 2, 128>}, {transform_indices = @transform_6, window_bounds = array<i64: 1, 2, 128>}, {transform_indices = @transform_7, window_bounds = array<i64: 1, 8, 128>}, {transform_indices = @transform_8, window_bounds = array<i64: 1, 1, 128>}, {transform_indices = @transform_9, window_bounds = array<i64: 1, 2, 128>}]} {
    %0 = arith.index_cast %arg0 : i32 to index
    %1 = memref.load %arg2[%0] : memref<8xf32, #tpu.memory_space<smem>>
    %cst = arith.constant 1.000000e+00 : f32
    %2 = arith.subf %cst, %1 : f32
    %c0 = arith.constant 0 : index
    %c0_0 = arith.constant 0 : index
    %c0_1 = arith.constant 0 : index
    %3 = vector.load %arg3[%c0, %c0_0, %c0_1] : memref<1x8x128xf32, #tpu.memory_space<vmem>>, vector<1x8x128xf32>
    %c0_2 = arith.constant 0 : index
    %c0_3 = arith.constant 0 : index
    %c0_4 = arith.constant 0 : index
    %4 = vector.load %arg4[%c0_2, %c0_3, %c0_4] : memref<1x8x128xf32, #tpu.memory_space<vmem>>, vector<1x8x128xf32>
    %5 = vector.broadcast %1 : f32 to vector<1x8x128xf32>
    %6 = arith.mulf %5, %3 : vector<1x8x128xf32>
    %7 = vector.broadcast %2 : f32 to vector<1x8x128xf32>
    %8 = arith.mulf %7, %4 : vector<1x8x128xf32>
    %9 = arith.addf %6, %8 : vector<1x8x128xf32>
    %c0_5 = arith.constant 0 : index
    %c0_6 = arith.constant 0 : index
    %c0_7 = arith.constant 0 : index
    %10 = vector.load %arg9[%c0_5, %c0_6, %c0_7] : memref<1x8x128xf32, #tpu.memory_space<vmem>>, vector<1x8x128xf32>
    tpu.vector_store %arg9[%c0_5, %c0_6, %c0_7], %9 {strides = array<i32>} : memref<1x8x128xf32, #tpu.memory_space<vmem>>, vector<1x8x128xf32>,
    %c0_8 = arith.constant 0 : index
    %c0_9 = arith.constant 0 : index
    %c0_10 = arith.constant 0 : index
    %11 = vector.load %arg5[%c0_8, %c0_9, %c0_10] : memref<1x1x128xf32, #tpu.memory_space<vmem>>, vector<1x1x128xf32>
    %c0_11 = arith.constant 0 : index
    %c0_12 = arith.constant 0 : index
    %c0_13 = arith.constant 0 : index
    %12 = vector.load %arg6[%c0_11, %c0_12, %c0_13] : memref<1x1x128xf32, #tpu.memory_space<vmem>>, vector<1x1x128xf32>
    %13 = vector.broadcast %1 : f32 to vector<1x1x128xf32>
    %14 = arith.mulf %13, %11 : vector<1x1x128xf32>
    %15 = vector.broadcast %2 : f32 to vector<1x1x128xf32>
    %16 = arith.mulf %15, %12 : vector<1x1x128xf32>
    %17 = arith.addf %14, %16 : vector<1x1x128xf32>
    %c0_14 = arith.constant 0 : index
    %c0_15 = arith.constant 0 : index
    %c0_16 = arith.constant 0 : index
    %18 = vector.load %arg10[%c0_14, %c0_15, %c0_16] : memref<1x1x128xf32, #tpu.memory_space<vmem>>, vector<1x1x128xf32>
    tpu.vector_store %arg10[%c0_14, %c0_15, %c0_16], %17 {strides = array<i32>} : memref<1x1x128xf32, #tpu.memory_space<vmem>>, vector<1x1x128xf32>,
    %c0_17 = arith.constant 0 : index
    %c0_18 = arith.constant 0 : index
    %c0_19 = arith.constant 0 : index
    %19 = vector.load %arg7[%c0_17, %c0_18, %c0_19] : memref<1x2x128xf32, #tpu.memory_space<vmem>>, vector<1x2x128xf32>
    %c0_20 = arith.constant 0 : index
    %c0_21 = arith.constant 0 : index
    %c0_22 = arith.constant 0 : index
    %20 = vector.load %arg8[%c0_20, %c0_21, %c0_22] : memref<1x2x128xf32, #tpu.memory_space<vmem>>, vector<1x2x128xf32>
    %21 = vector.broadcast %1 : f32 to vector<1x2x128xf32>
    %22 = arith.mulf %21, %19 : vector<1x2x128xf32>
    %23 = vector.broadcast %2 : f32 to vector<1x2x128xf32>
    %24 = arith.mulf %23, %20 : vector<1x2x128xf32>
    %25 = arith.addf %22, %24 : vector<1x2x128xf32>
    %c0_23 = arith.constant 0 : index
    %c0_24 = arith.constant 0 : index
    %c0_25 = arith.constant 0 : index
    %26 = vector.load %arg11[%c0_23, %c0_24, %c0_25] : memref<1x2x128xf32, #tpu.memory_space<vmem>>, vector<1x2x128xf32>
    tpu.vector_store %arg11[%c0_23, %c0_24, %c0_25], %25 {strides = array<i32>} : memref<1x2x128xf32, #tpu.memory_space<vmem>>, vector<1x2x128xf32>,
    return
  }
  func.func @transform_0(%arg0: i32, %arg1: memref<8xi32, #tpu.memory_space<smem>>) -> i32 {
    %c0_i32 = arith.constant 0 : i32
    %c0_i32_0 = arith.constant 0 : i32
    return %c0_i32 : i32
  }
  func.func @transform_1(%arg0: i32, %arg1: memref<8xi32, #tpu.memory_space<smem>>) -> (i32, i32, i32) {
    %c0_i32 = arith.constant 0 : i32
    %c0_i32_0 = arith.constant 0 : i32
    %c0_i32_1 = arith.constant 0 : i32
    return %arg0, %c0_i32, %c0_i32_0 : i32, i32, i32
  }
  func.func @transform_2(%arg0: i32, %arg1: memref<8xi32, #tpu.memory_space<smem>>) -> (i32, i32, i32) {
    %0 = arith.index_cast %arg0 : i32 to index
    %1 = memref.load %arg1[%0] : memref<8xi32, #tpu.memory_space<smem>>
    %c0_i32 = arith.constant 0 : i32
    %c0_i32_0 = arith.constant 0 : i32
    %c0_i32_1 = arith.constant 0 : i32
    return %1, %c0_i32, %c0_i32_0 : i32, i32, i32
  }
  func.func @transform_3(%arg0: i32, %arg1: memref<8xi32, #tpu.memory_space<smem>>) -> (i32, i32, i32) {
    %c0_i32 = arith.constant 0 : i32
    %c0_i32_0 = arith.constant 0 : i32
    %c0_i32_1 = arith.constant 0 : i32
    return %arg0, %c0_i32, %c0_i32_0 : i32, i32, i32
  }
  func.func @transform_4(%arg0: i32, %arg1: memref<8xi32, #tpu.memory_space<smem>>) -> (i32, i32, i32) {
    %0 = arith.index_cast %arg0 : i32 to index
    %1 = memref.load %arg1[%0] : memref<8xi32, #tpu.memory_space<smem>>
    %c0_i32 = arith.constant 0 : i32
    %c0_i32_0 = arith.constant 0 : i32
    %c0_i32_1 = arith.constant 0 : i32
    return %1, %c0_i32, %c0_i32_0 : i32, i32, i32
  }
  func.func @transform_5(%arg0: i32, %arg1: memref<8xi32, #tpu.memory_space<smem>>) -> (i32, i32, i32) {
    %c0_i32 = arith.constant 0 : i32
    %c0_i32_0 = arith.constant 0 : i32
    %c0_i32_1 = arith.constant 0 : i32
    return %arg0, %c0_i32, %c0_i32_0 : i32, i32, i32
  }
  func.func @transform_6(%arg0: i32, %arg1: memref<8xi32, #tpu.memory_space<smem>>) -> (i32, i32, i32) {
    %0 = arith.index_cast %arg0 : i32 to index
    %1 = memref.load %arg1[%0] : memref<8xi32, #tpu.memory_space<smem>>
    %c0_i32 = arith.constant 0 : i32
    %c0_i32_0 = arith.constant 0 : i32
    %c0_i32_1 = arith.constant 0 : i32
    return %1, %c0_i32, %c0_i32_0 : i32, i32, i32
  }
  func.func @transform_7(%arg0: i32, %arg1: memref<8xi32, #tpu.memory_space<smem>>) -> (i32, i32, i32) {
    %c0_i32 = arith.constant 0 : i32
    %c0_i32_0 = arith.constant 0 : i32
    %c0_i32_1 = arith.constant 0 : i32
    return %arg0, %c0_i32, %c0_i32_0 : i32, i32, i32
  }
  func.func @transform_8(%arg0: i32, %arg1: memref<8xi32, #tpu.memory_space<smem>>) -> (i32, i32, i32) {
    %c0_i32 = arith.constant 0 : i32
    %c0_i32_0 = arith.constant 0 : i32
    %c0_i32_1 = arith.constant 0 : i32
    return %arg0, %c0_i32, %c0_i32_0 : i32, i32, i32
  }
  func.func @transform_9(%arg0: i32, %arg1: memref<8xi32, #tpu.memory_space<smem>>) -> (i32, i32, i32) {
    %c0_i32 = arith.constant 0 : i32
    %c0_i32_0 = arith.constant 0 : i32
    %c0_i32_1 = arith.constant 0 : i32
    return %arg0, %c0_i32, %c0_i32_0 : i32, i32, i32
  }
}

</mosaic_0001>

<bundles_post_ra>
// kernel: tpu_custom_call.1
= control target key start
LH: loop header
LB: loop body
LE: loop exit
PB: predicated region body
PF: predicated region fallthrough
CT: control target
= control target key end

     0   :  { %s1534_s16 = smov [#allocation3]   ;;  %s2141_s0 = inlined_call_operand.hbm [shape: s32[8], index: 0, kind: input, shape index: {}]   ;;  %s2142_s1 = inlined_call_operand.hbm [shape: f32[8], index: 1, kind: input, shape index: {}]   ;;  %s2143_s2 = inlined_call_operand.hbm [shape: f32[8,8,128], index: 2, kind: input, shape index: {}]   ;;  %s2144_s3 = inlined_call_operand.hbm [shape: f32[8,8,128], index: 3, kind: input, shape index: {}]   ;;  %s2145_s4 = inlined_call_operand.hbm [shape: f32[8,1,128], index: 4, kind: input, shape index: {}]   ;;  %s2146_s5 = inlined_call_operand.hbm [shape: f32[8,1,128], index: 5, kind: input, shape index: {}]   ;;  %s2147_s6 = inlined_call_operand.hbm [shape: f32[8,2,128], index: 6, kind: input, shape index: {}]   ;;  %s2148_s7 = inlined_call_operand.hbm [shape: f32[8,2,128], index: 7, kind: input, shape index: {}]   ;;  %s2149_s8 = inlined_call_operand.hbm [shape: f32[8,8,128], index: 8, kind: output, shape index: {0}]   ;;  %s2150_s9 = inlined_call_operand.hbm [shape: f32[8,1,128], index: 9, kind: output, shape index: {1}]   ;;  %s2151_s10 = inlined_call_operand.hbm [shape: f32[8,2,128], index: 10, kind: output, shape index: {2}]  }
   0x1   :  { %2176 = sst [smem:[#allocation50_spill]] %s2142_s1  ;;  %s17_s15 = sshll.u32 %s2141_s0, 4  ;;  %s18_s15 = int_to_ptr.hbm [resolvable:$true] %s17_s15 }
   0x2   :  { %2177 = sst [smem:[#allocation51_spill]] %s2143_s2 }
   0x3   :  { %2178 = sst [smem:[#allocation52_spill]] %s2144_s3 }
   0x4   :  { %2179 = sst [smem:[#allocation53_spill]] %s2145_s4 }
   0x5   :  { %2180 = sst [smem:[#allocation54_spill]] %s2146_s5 }
   0x6   :  { %2181 = sst [smem:[#allocation55_spill]] %s2147_s6 }
   0x7   :  { %2182 = sst [smem:[#allocation56_spill]] %s2148_s7 }
   0x8   :  { %2183 = sst [smem:[#allocation57_spill]] %s2149_s8 }
   0x9   :  { %2184 = sst [smem:[#allocation58_spill]] %s2150_s9 }
   0xa   :  { %2185 = sst [smem:[#allocation59_spill]] %s2151_s10 }
   0xb   :  { %20 = dma.hbm_to_smem %s18_s15, 16, %s1534_s16, [#allocation2] }
   0xc   :  { %1444 = dma.done.wait [#allocation2], 16 }
   0xd   :  { %1445 = vsyncadd [#allocation2], 4294967280 }
   0xe   :  { %23 = sfence }
   0xf   :  { %24 = vsyncpa [#allocation7], 0 }
  0x10   :  { %25 = vsyncpa [#allocation5], 0 }
  0x11   :  { %27 = vsyncpa [#allocation5 + $0x1], 0 }
  0x12   :  { %28 = vsyncpa [#allocation10], 0 }
  0x13   :  { %30 = vsyncpa [#allocation10 + $0x1], 0 }
  0x14   :  { %31 = vsyncpa [#allocation13], 0 }
  0x15   :  { %33 = vsyncpa [#allocation13 + $0x1], 0 }
  0x16   :  { %34 = vsyncpa [#allocation16], 0 }
  0x17   :  { %36 = vsyncpa [#allocation16 + $0x1], 0 }
  0x18   :  { %37 = vsyncpa [#allocation6], 0 }
  0x19   :  { %39 = vsyncpa [#allocation6 + $0x1], 0 }
  0x1a   :  { %40 = vsyncpa [#allocation19], 0 }
  0x1b   :  { %42 = vsyncpa [#allocation19 + $0x1], 0  ;;  %s1594_s0 = smov 0   ;;  %s1596_s17 = smov 0  }
  0x1c   :  { %s1598_s18 = smov 0   ;;  %s1600_s19 = smov 0  }
  0x1d   :  { %s1602_s20 = smov 0   ;;  %s1604_s21 = smov 0  }
  0x1e   :  { %s1606_s22 = smov 0   ;;  %s1608_s23 = smov 0  }
  0x1f   :  { %s1610_s24 = smov 0   ;;  %s1612_s25 = smov 0  }
  0x20   :  { %s1614_s26 = smov 0   ;;  %s1616_s27 = smov 0  }
  0x21   :  { %s1618_s28 = smov 0  }
  0x22 LB: > { %2186 = sst [smem:[#allocation37_spill]] %s1500_s20  ;;  %s1658_s29 = sadd.s32 4294967295, %s1532_s28   ;;  %s1532_s28 = sphi %s1618_s28, %s2266_s28   ;;  %s1528_s27 = sphi %s1616_s27, %s2262_s27   ;;  %s1524_s26 = sphi %s1614_s26, %s2261_s26   ;;  %s1520_s25 = sphi %s1612_s25, %s2260_s25   ;;  %s1516_s24 = sphi %s1610_s24, %s2259_s24   ;;  %s1512_s23 = sphi %s1608_s23, %s2258_s23   ;;  %s1508_s22 = sphi %s1606_s22, %s2257_s22   ;;  %s1504_s21 = sphi %s1604_s21, %s2256_s21   ;;  %s1500_s20 = sphi %s1602_s20, %s2255_s20   ;;  %s1496_s19 = sphi %s1600_s19, %s2254_s19   ;;  %s1492_s18 = sphi %s1598_s18, %s2265_s18   ;;  %s1488_s17 = sphi %s1596_s17, %s2264_s17   ;;  %s1484_s0 = sphi %s1594_s0, %s2263_s0  }
  0x23   : > { %2187 = sst [smem:[#allocation38_spill]] %s1504_s21  ;;  %s1661_s30 = sadd.s32 1, %s1532_s28  }
  0x24   : > { %2188 = sst [smem:[#allocation39_spill]] %s1512_s23  ;;  %p2162_p0 = scmp.eq.s32.totalorder %s1532_s28, 0 }
  0x25   : > { %2189 = sst [smem:[#allocation40_spill]] %s1516_s24  ;;  %p2170_p1 = scmp.eq.s32.totalorder %s1658_s29, 0 }
  0x26   : > { %2190 = sst [smem:[#allocation41_spill]] %s1524_s26  ;;  %s104_s12 = sadd.s32 1, %s1516_s24 }
  0x27   : > { %2191 = sst [smem:[#allocation42_spill]] %s1528_s27  ;;  %p111_p2 = scmp.ne.s32.totalorder %s1516_s24, %s1512_s23 }
  0x28   : > { %s99_s11 = sld [smem:[#allocation3 + %s1532_s28]]  ;;  %p117_p3 = scmp.ne.s32.totalorder %s1512_s23, %s1508_s22 }
  0x29   : > { %s100_s13 = sld [smem:[#allocation3 + %s1661_s30]]  ;;  %p1673_p4 = por %p111_p2, %p2162_p0 }
  0x2a   : > { %p1679_p5 = por %p117_p3, %p2170_p1  ;;  %p2165_p6 = scmp.lt.s32.totalorder %s1532_s28, 8 }
  0x2b   : > { %s358_s10 = sand.u32 1, %s1516_s24   ;;  %p165_p9 = scmp.ne.s32.totalorder %s1504_s21, %s1500_s20 }
  0x2c   : > { %s2193_s15 = scalar_select %p1679_p5, 1, 0 }
  0x2d   : > { %s904_s22 = sshll.u32 %s358_s10, 3  ;;  %p1705_p8 = pnand %p2165_p6, %p1673_p4 }
  0x2e   : > { %2194 = sst [smem:[#allocation43_spill]] %s2193_s15  ;;  %s360_s9 = scalar_lea.vmem [#allocation9], %s904_s22 }
  0x2f   : > { %s101_s8 = ssub.s32 %s99_s11, %s100_s13  ;;  %s1686_s23 = sshll.u32 %s360_s9, 4 }
  0x30   : > { %p102_p7 = scmp.eq.s32.totalorder %s101_s8, 0  ;;  %2195 = sst [smem:[#allocation44_spill]] %s1686_s23 }
  0x31   : > { %s927_s15 = scalar_select %p1673_p4, [#allocation3], [#allocation21] }
  0x32   : > { %s1691_s7 = scalar_select %p102_p7, %s1516_s24, %s104_s12  }
  0x33   : > { %s928_s16 = scalar_select %p1673_p4, %s1532_s28, 0 }
  0x34   : > { %2196 = sst [smem:[#allocation45_spill]] %s1691_s7  ;;  %s2268_s15 = smov (!%p2165_p6, %s927_s15), [#allocation24] }
  0x35   : > { %s2270_s16 = smov (!%p2165_p6, %s928_s16), 0  ;;  %s153_s10 = sld [smem:[#allocation3 + %s1532_s28]] }
  0x36   : > { %s361_s9 = sld [smem:[%s2268_s15 + %s2270_s16]]  ;;  %p171_p10 = scmp.ne.s32.totalorder %s1500_s20, %s1496_s19 }
  0x37   : > { %s154_s12 = sld [smem:[#allocation3 + %s1661_s30]]  ;;  %p1721_p11 = por %p165_p9, %p2162_p0 }
  0x38   : > { %s2198_s3 = sld [smem:[#allocation52_spill]]  ;;  %p1727_p12 = por %p171_p10, %p2170_p1 }
  0x39   : > { %s2202_s16 = sand.u32 1, %s1532_s28   ;;  %p1117_p2 = pneg %p1705_p8 }
  0x3a   : > { %s2200_s15 = scalar_select %p1727_p12, 1, 0 }
  0x3b   : > { %s1733_s11 = scalar_lea.sflag [#allocation10], %s2202_s16 }
  0x3c   : > { %s905_s13 = sshll.u32 %s361_s9, 3  ;;  %2201 = sst [smem:[#allocation46_spill]] %s2200_s15 }
  0x3e   : > { %s365_s24 = scalar_lea.hbm %s2198_s3, %s905_s13 }
  0x3f   : > { %s367_s23 = sshll.u32 %s365_s24, 4  ;;  %s1120_s24 = scalar_lea.hbm %s2198_s3, 64  ;;  %s368_s23 = int_to_ptr.hbm [resolvable:$true] %s367_s23 }
  0x40   : > { %s1113_s19 = sshra.s32 %s368_s23, 4  ;;  %s1114_s19 = int_to_ptr.hbm [resolvable:$true] %s1113_s19 }
  0x41   : > { %s1115_s9 = scalar_lea.hbm %s1114_s19, 8  ;;  %p1121_p7 = scmp.lt.s32.totalorder %s1114_s19, %s2198_s3 }
  0x42   : > { %p1116_p13 = scmp.ne.s32.totalorder %s1114_s19, %s1115_s9  ;;  %p1122_p9 = scmp.lt.s32.totalorder %s1120_s24, %s1115_s9 }
  0x44   : > { %p1118_p3 = pnand %p1117_p2, %p1116_p13  ;;  %p1123_p10 = por %p1122_p9, %p1121_p7 }
  0x46   : > { %p1119_p4 = pneg %p1118_p3 }
  0x48   : > { %p1124_p0 = pnand %p1123_p10, %p1119_p4 }
  0x4a   : > { %1127 = shalt.err (!%p1124_p0)
}
  0x4b   : > { %s2203_s16 = sld [smem:[#allocation44_spill]]  ;;  %s155_s20 = ssub.s32 %s153_s10, %s154_s12 }
  0x4c   : > { %s395_s19 = sand.u32 1, %s1504_s21   ;;  %p156_p0 = scmp.eq.s32.totalorder %s155_s20, 0 }
  0x4d   : > { %s931_s8 = scalar_select %p1721_p11, [#allocation3], [#allocation22] }
  0x4e   : > { %s2205_s9 = sadd.s32 1, %s1504_s21  ;;  %s396_s24 = scalar_lea.vmem [#allocation12], %s395_s19 }
  0x4f   : > { %s1754_s7 = scalar_select %p156_p0, %s1504_s21, %s2205_s9  }
  0x50   : > { %s932_s13 = scalar_select %p1721_p11, %s1532_s28, 0 }
  0x51   : > { %s2204_s15 = int_to_ptr.vmem [resolvable:$true] %s2203_s16  ;;  %2206 = sst [smem:[#allocation47_spill]] %s1754_s7 }
  0x52   : > { %964 = dma.hbm_to_vmem [thread:$0]  (!%p1705_p8), %s368_s23, 128, %s2204_s15, %s1733_s11  }
  0x53   : > { %s2272_s8 = smov (!%p2165_p6, %s931_s8), [#allocation25]  ;;  %s2274_s13 = smov (!%p2165_p6, %s932_s13), 0 }
  0x54   : > { %s404_s22 = sshll.u32 %s396_s24, 4  ;;  %p1767_p8 = pnand %p2165_p6, %p1721_p11  ;;  %s405_s22 = int_to_ptr.vmem [resolvable:$true] %s404_s22 }
  0x55   : > { %s397_s10 = sld [smem:[%s2272_s8 + %s2274_s13]]  ;;  %p899_p13 = scmp.ge.s32.totalorder %s1532_s28, 1 }
  0x56   : > { %p314_p2 = scmp.lt.s32.totalorder %s1532_s28, 9  ;;  %s2208_s1 = sld [smem:[#allocation50_spill]] }
  0x57   : > { %s2210_s5 = sld [smem:[#allocation54_spill]]  ;;  %s2212_s24 = sand.u32 1, %s1532_s28  }
  0x58   : > { %p1776_p3 = pnand %p899_p13, %p314_p2  ;;  %s1793_s12 = scalar_lea.sflag [#allocation13], %s2212_s24 }
  0x59   : > { %p1147_p9 = pneg %p1767_p8 }
  0x5a   : > { %p952_p11 = pneg %p1776_p3 }
  0x5c   : > { %s326_s16 = sshll.u32 %s2208_s1, 4  ;;  %p1787_p4 = pnand %p952_p11, %p2170_p1  ;;  %s327_s16 = int_to_ptr.hbm [resolvable:$true] %s326_s16 }
  0x5d   : > { %s400_s9 = scalar_lea.hbm %s2210_s5, %s397_s10  ;;  %s1150_s19 = scalar_lea.hbm %s2210_s5, 8 }
  0x5e   : > { %s402_s8 = sshll.u32 %s400_s9, 4  ;;  %s403_s8 = int_to_ptr.hbm [resolvable:$true] %s402_s8 }
  0x5f   : > { %s1143_s15 = sshra.s32 %s403_s8, 4  ;;  %s1144_s15 = int_to_ptr.hbm [resolvable:$true] %s1143_s15 }
  0x60   : > { %s1145_s1 = scalar_lea.hbm %s1144_s15, 1  ;;  %p1151_p13 = scmp.lt.s32.totalorder %s1144_s15, %s2210_s5 }
  0x61   : > { %p1146_p7 = scmp.ne.s32.totalorder %s1144_s15, %s1145_s1  ;;  %p1152_p2 = scmp.lt.s32.totalorder %s1150_s19, %s1145_s1 }
  0x63   : > { %p1148_p10 = pnand %p1147_p9, %p1146_p7  ;;  %p1153_p11 = por %p1152_p2, %p1151_p13 }
  0x65   : > { %p1149_p0 = pneg %p1148_p10 }
  0x67   : > { %p1154_p6 = pnand %p1153_p11, %p1149_p0 }
  0x69   : > { %1157 = shalt.err (!%p1154_p6)
}
  0x6a   : > { %972 = dma.hbm_to_vmem [thread:$0]  (!%p1767_p8), %s403_s8, 16, %s405_s22, %s1793_s12  }
  0x6b   : > { %s1535_s1 = smov [#allocation4]   ;;  %s2166_s3 = sadd.s32 4294967294, %s1532_s28  }
  0x6c   : > { %955 = dma.hbm_to_smem (!%p1787_p4), %s327_s16, 16, %s1535_s1, [#allocation7]  }
  0x6d   : > { %s73_s23 = ssub.s32 %s1532_s28, %s1661_s30  ;;  %s76_s24 = sadd.s32 1, %s1528_s27 }
  0x6e   : > { %p74_p6 = scmp.eq.s32.totalorder %s73_s23, 0  ;;  %p83_p7 = scmp.ne.s32.totalorder %s1528_s27, %s1524_s26 }
  0x6f   : > { %p89_p9 = scmp.ne.s32.totalorder %s1524_s26, %s1520_s25  ;;  %p249_p10 = scmp.eq.s32.totalorder %s1658_s29, 7 }
  0x70   : > { %s1818_s15 = scalar_select %p74_p6, %s1528_s27, %s76_s24  }
  0x71   : > { %p2214_p0 = scmp.eq.s32.totalorder %s1532_s28, 0  ;;  %p1828_p8 = por %p2170_p1, %p89_p9 }
  0x72   : > { %2213 = sst [smem:[#allocation48_spill]] %s1818_s15  ;;  %p1832_p4 = por %p249_p10, %p83_p7 }
  0x73   : > { %p1822_p13 = por %p2214_p0, %p83_p7  ;;  %p255_p2 = scmp.eq.s32.totalorder %s2166_s3, 7 }
  0x74   : > { %s2217_s16 = scalar_select %p1832_p4, 1, 0 }
  0x75   : > { %s1839_s8 = sand.u32 1, %s1528_s27   ;;  %s903_s13 = sshll.u32 %s1532_s28, 3 }
  0x76   : > { %p1842_p11 = por %p255_p2, %p89_p9  ;;  %s902_s19 = sshll.u32 %s1839_s8, 3 }
  0x77   : > { %s2220_s2 = sld [smem:[#allocation51_spill]]  ;;  %s341_s5 = scalar_lea.vmem [#allocation8], %s902_s19 }
  0x78   : > { %s2218_s14 = scalar_select %p1842_p11, 1, 0 }
  0x79   : > { %s349_s15 = sshll.u32 %s341_s5, 4  ;;  %p2221_p6 = scmp.lt.s32.totalorder %s1532_s28, 8  ;;  %s350_s15 = int_to_ptr.vmem [resolvable:$true] %s349_s15 }
  0x7a   : > { %2219 = sst [smem:[#allocation44_spill]] %s2218_s14 }
  0x7b   : > { %p1854_p7 = pnand %p2221_p6, %p1822_p13  ;;  %s2223_s4 = sld [smem:[#allocation53_spill]] }
  0x7d   : > { %s345_s23 = scalar_lea.hbm %s2220_s2, %s903_s13  ;;  %s338_s13 = scalar_lea.sflag [#allocation5], %s1839_s8 }
  0x7e   : > { %s347_s24 = sshll.u32 %s345_s23, 4  ;;  %p1192_p10 = pneg %p1854_p7  ;;  %s348_s24 = int_to_ptr.hbm [resolvable:$true] %s347_s24 }
  0x7f   : > { %s1188_s9 = sshra.s32 %s348_s24, 4  ;;  %s1195_s27 = scalar_lea.hbm %s2220_s2, 64  ;;  %s1189_s9 = int_to_ptr.hbm [resolvable:$true] %s1188_s9 }
  0x80   : > { %s1190_s19 = scalar_lea.hbm %s1189_s9, 8  ;;  %p1196_p2 = scmp.lt.s32.totalorder %s1189_s9, %s2220_s2 }
  0x81   : > { %s382_s21 = scalar_lea.hbm %s2223_s4, %s1532_s28  ;;  %p1191_p9 = scmp.ne.s32.totalorder %s1189_s9, %s1190_s19 }
  0x82   : > { %s1862_s14 = sshll.u32 %s382_s21, 4  ;;  %p1197_p6 = scmp.lt.s32.totalorder %s1195_s27, %s1190_s19  ;;  %s385_s14 = int_to_ptr.hbm [resolvable:$true] %s1862_s14 }
  0x83   : > { %p1193_p0 = pnand %p1192_p10, %p1191_p9 }
  0x84   : > { %p1198_p1 = por %p1197_p6, %p1196_p2 }
  0x85   : > { %p1194_p13 = pneg %p1193_p0 }
  0x87   : > { %p1199_p11 = pnand %p1198_p1, %p1194_p13 }
  0x89   : > { %1202 = shalt.err (!%p1199_p11)
}
  0x8a   : > { %959 = dma.hbm_to_vmem [thread:$0]  (!%p1854_p7), %s348_s24, 128, %s350_s15, %s338_s13  }
  0x8b   : > { %s379_s21 = scalar_lea.vmem [#allocation11], %s1839_s8  ;;  %s906_s5 = sshll.u32 %s1839_s8, 1 }
  0x8c   : > { %s386_s23 = sshll.u32 %s379_s21, 4  ;;  %s1218_s10 = sshra.s32 %s385_s14, 4  ;;  %s387_s23 = int_to_ptr.vmem [resolvable:$true] %s386_s23  ;;  %s1219_s10 = int_to_ptr.hbm [resolvable:$true] %s1218_s10 }
  0x8d   : > { %s1220_s7 = scalar_lea.hbm %s1219_s10, 1  ;;  %s1225_s27 = scalar_lea.hbm %s2223_s4, 8 }
  0x8e   : > { %p1221_p9 = scmp.ne.s32.totalorder %s1219_s10, %s1220_s7  ;;  %p1226_p0 = scmp.lt.s32.totalorder %s1219_s10, %s2223_s4 }
  0x8f   : > { %p1227_p13 = scmp.lt.s32.totalorder %s1225_s27, %s1220_s7 }
  0x90   : > { %p1223_p1 = pnand %p1221_p9, %p1192_p10 }
  0x91   : > { %p1228_p2 = por %p1227_p13, %p1226_p0 }
  0x92   : > { %p1224_p11 = pneg %p1223_p1 }
  0x94   : > { %p1229_p6 = pnand %p1228_p2, %p1224_p11 }
  0x96   : > { %1232 = shalt.err (!%p1229_p6)
}
  0x97   : > { %967 = dma.hbm_to_vmem [thread:$0]  (!%p1854_p7), %s385_s14, 16, %s387_s23, %s1733_s11  }
  0x98   : > { %s907_s15 = sshll.u32 %s1532_s28, 1  ;;  %s2224_s6 = sld [smem:[#allocation55_spill]] }
  0x99   : > { %s415_s21 = scalar_lea.vmem [#allocation14], %s906_s5 }
  0x9a   : > { %s423_s9 = sshll.u32 %s415_s21, 4  ;;  %s424_s9 = int_to_ptr.vmem [resolvable:$true] %s423_s9 }
  0x9e   : > { %s419_s13 = scalar_lea.hbm %s2224_s6, %s907_s15  ;;  %s1255_s14 = scalar_lea.hbm %s2224_s6, 16 }
  0x9f   : > { %s421_s19 = sshll.u32 %s419_s13, 4  ;;  %s422_s19 = int_to_ptr.hbm [resolvable:$true] %s421_s19 }
  0xa0   : > { %s1248_s2 = sshra.s32 %s422_s19, 4  ;;  %s1249_s2 = int_to_ptr.hbm [resolvable:$true] %s1248_s2 }
  0xa1   : > { %s1250_s10 = scalar_lea.hbm %s1249_s2, 2  ;;  %p1256_p0 = scmp.lt.s32.totalorder %s1249_s2, %s2224_s6 }
  0xa2   : > { %p1251_p9 = scmp.ne.s32.totalorder %s1249_s2, %s1250_s10  ;;  %p1257_p13 = scmp.lt.s32.totalorder %s1255_s14, %s1250_s10 }
  0xa4   : > { %p1253_p1 = pnand %p1251_p9, %p1192_p10  ;;  %p1258_p2 = por %p1257_p13, %p1256_p0 }
  0xa6   : > { %p1254_p11 = pneg %p1253_p1 }
  0xa8   : > { %p1259_p6 = pnand %p1258_p2, %p1254_p11 }
  0xaa   : > { %1262 = shalt.err (!%p1259_p6)
}
  0xab   : > { %975 = dma.hbm_to_vmem [thread:$0]  (!%p1854_p7), %s422_s19, 32, %s424_s9, %s1793_s12  }
  0xac   : > { %s207_s5 = sld [smem:[#allocation3 + %s1532_s28]]  ;;  %p219_p10 = scmp.ne.s32.totalorder %s1492_s18, %s1488_s17 }
  0xad   : > { %s208_s1 = sld [smem:[#allocation3 + %s1661_s30]]  ;;  %p225_p9 = scmp.ne.s32.totalorder %s1488_s17, %s1484_s0 }
  0xae   : > { %p2225_p1 = scmp.eq.s32.totalorder %s1658_s29, 0  ;;  %s430_s15 = sand.u32 1, %s1492_s18  }
  0xaf   : > { %p2227_p0 = scmp.eq.s32.totalorder %s1532_s28, 0  ;;  %s212_s8 = sadd.s32 1, %s1492_s18 }
  0xb0   : > { %p1917_p11 = por %p225_p9, %p2225_p1  ;;  %s908_s13 = sshll.u32 %s430_s15, 1 }
  0xb1   : > { %p221_p13 = por %p219_p10, %p2227_p0  ;;  %p2228_p6 = scmp.lt.s32.totalorder %s1532_s28, 8 }
  0xb2   : > { %s434_s2 = scalar_lea.vmem [#allocation15], %s908_s13  ;;  %s2232_s23 = sld [smem:[#allocation56_spill]] }
  0xb3   : > { %s209_s24 = ssub.s32 %s207_s5, %s208_s1  ;;  %p1927_p7 = pnand %p2228_p6, %p221_p13 }
  0xb4   : > { %p210_p2 = scmp.eq.s32.totalorder %s209_s24, 0  ;;  %p2230_p9 = pmov %p2228_p6 }
  0xb5   : > { %s935_s21 = scalar_select %p221_p13, [#allocation3], [#allocation23] }
  0xb6   : > { %s1932_s9 = scalar_select %p210_p2, %s1492_s18, %s212_s8  }
  0xb7   : > { %s936_s0 = scalar_select %p221_p13, %s1532_s28, 0 }
  0xb8   : > { %s2276_s21 = smov (!%p2230_p9, %s935_s21), [#allocation26]  ;;  %p2231_p1 = pmov %p2228_p6 }
  0xb9   : > { %s443_s10 = sshll.u32 %s434_s2, 4  ;;  %s2233_s5 = smov %s2232_s23  ;;  %s444_s10 = int_to_ptr.vmem [resolvable:$true] %s443_s10 }
  0xba   : > { %s2278_s0 = smov (!%p2231_p1, %s936_s0), 0  ;;  %s431_s24 = scalar_lea.sflag [#allocation16], %s430_s15 }
  0xbb   : > { %s435_s19 = sld [smem:[%s2276_s21 + %s2278_s0]]  ;;  %p1282_p0 = pneg %p1927_p7 }
  0xbc   : > { %s1285_s0 = scalar_lea.hbm %s2233_s5, 16 }
  0xc1   : > { %s909_s7 = sshll.u32 %s435_s19, 1 }
  0xc2   : > { %s439_s27 = scalar_lea.hbm %s2232_s23, %s909_s7 }
  0xc3   : > { %s441_s1 = sshll.u32 %s439_s27, 4  ;;  %s442_s1 = int_to_ptr.hbm [resolvable:$true] %s441_s1 }
  0xc4   : > { %s1278_s8 = sshra.s32 %s442_s1, 4  ;;  %s1279_s8 = int_to_ptr.hbm [resolvable:$true] %s1278_s8 }
  0xc5   : > { %s1280_s4 = scalar_lea.hbm %s1279_s8, 2  ;;  %p1286_p6 = scmp.lt.s32.totalorder %s1279_s8, %s2233_s5 }
  0xc6   : > { %p1281_p10 = scmp.ne.s32.totalorder %s1279_s8, %s1280_s4  ;;  %p1287_p9 = scmp.lt.s32.totalorder %s1285_s0, %s1280_s4 }
  0xc8   : > { %p1283_p13 = pnand %p1282_p0, %p1281_p10  ;;  %p1288_p1 = por %p1287_p9, %p1286_p6 }
  0xca   : > { %p1284_p2 = pneg %p1283_p13 }
  0xcc   : > { %p1289_p4 = pnand %p1288_p1, %p1284_p2 }
  0xce   : > { %1292 = shalt.err (!%p1289_p4)
}
  0xcf   : > { %980 = dma.hbm_to_vmem [thread:$0]  (!%p1927_p7), %s442_s1, 32, %s444_s10, %s431_s24  }
  0xd0   : > { %452 = sbr.rel (%p1776_p3) target bundleno = 299 (0x12b), region = 48 }
  0xd5   : > { %p2234_p10 = scmp.eq.s32.totalorder %s1658_s29, 0 }
  0xd7   : > { %1447 = dma.done.wait (%p2234_p10), [#allocation7], 16   ;;  %p2235_p0 = pmov %p2234_p10 }
  0xd8   : > { %s1959_s15 = sand.u32 1, %s1524_s26  }
  0xd9   : > { %1449 = vsyncadd (%p2235_p0), [#allocation7], 4294967280  ;;  %s912_s4 = sshll.u32 %s1959_s15, 3  ;;  %s460_s7 = scalar_lea.sflag [#allocation5], %s1959_s15 }
  0xda   : > { %s1965_s12 = scalar_lea.vmem [#allocation8], %s912_s4 }
  0xdb   : > { %1451 = dma.done.wait (%p1828_p8), %s460_s7, 128  }
  0xdc   : > { %1453 = vsyncadd (%p1828_p8), %s460_s7, 4294967168  ;;  %s2236_s20 = sld [smem:[#allocation39_spill]]  ;;  %s1972_s11 = sand.u32 1, %s1658_s29  }
  0xdd   : > { %s470_s27 = scalar_lea.sflag [#allocation10], %s1972_s11 }
  0xe2   : > { %s471_s14 = sand.u32 1, %s2236_s20  }
  0xe3   : > { %s1975_s23 = sshll.u32 %s471_s14, 3 }
  0xe4   : > { %1455 = dma.done.wait (%p1679_p5), %s470_s27, 128  }
  0xe5   : > { %1457 = vsyncadd (%p1679_p5), %s470_s27, 4294967168  ;;  %s482_s24 = scalar_lea.vmem [#allocation11], %s1959_s15 }
  0xe6   : > { %1459 = dma.done.wait (%p1828_p8), %s470_s27, 16  }
  0xe7   : > { %1461 = vsyncadd (%p1828_p8), %s470_s27, 4294967280  ;;  %s2238_s8 = sld [smem:[#allocation37_spill]]  ;;  %s489_s0 = scalar_lea.sflag [#allocation13], %s1972_s11 }
  0xed   : > { %s490_s13 = sand.u32 1, %s2238_s8  }
  0xee   : > { %s491_s19 = scalar_lea.vmem [#allocation12], %s490_s13 }
  0xef   : > { %1463 = dma.done.wait (%p1727_p12), %s489_s0, 16  }
  0xf0   : > { %1465 = vsyncadd (%p1727_p12), %s489_s0, 4294967280  ;;  %s914_s2 = sshll.u32 %s1959_s15, 1 }
  0xf1   : > { %s501_s7 = scalar_lea.vmem [#allocation14], %s914_s2 }
  0xf2   : > { %1467 = dma.done.wait (%p1828_p8), %s489_s0, 32  }
  0xf3   : > { %1469 = vsyncadd (%p1828_p8), %s489_s0, 4294967264  ;;  %s507_s20 = sand.u32 1, %s1488_s17  }
  0xf4   : > { %s915_s10 = sshll.u32 %s507_s20, 1  ;;  %s508_s14 = scalar_lea.sflag [#allocation16], %s507_s20 }
  0xf5   : > { %s511_s27 = scalar_lea.vmem [#allocation15], %s915_s10 }
  0xf6   : > { %1471 = dma.done.wait (%p1917_p11), %s508_s14, 32  }
  0xf7   : > { %1473 = vsyncadd (%p1917_p11), %s508_s14, 4294967264 }
  0xf8   : > { %517 = sfence }
  0xf9   : > { %s583_s22 = sld [smem:[#allocation4 + %s1658_s29]]  ;;  %s2172_s8 = scalar_lea.vmem [#allocation18], %s1959_s15  ;;  %v593_v0 = vld [vmem:[%s482_s24] sm:$0x1]  ;;  %v599_v2 = vld [vmem:[%s501_s7] sm:$0x3] }
  0xfa   : > { %s2008_s21 = sshll.u32 %s2172_s8, 4  ;;  %s2012_s13 = scalar_lea.vmem [#allocation17], %s912_s4  ;;  %v585_v1 = vld [vmem:[%s1965_s12] sm:$0xff] }
  0xfb   : > { %2240 = sst [smem:[#allocation49_spill]] %s2008_s21  ;;  %s627_s3 = sshll.u32 %s2012_s13, 4  ;;  %v594_v4 = vld [vmem:[%s491_s19] sm:$0x1]  ;;  %v600_v6 = vld [vmem:[%s511_s27] sm:$0x3]  ;;  %s2023_s3 = int_to_ptr.vmem [resolvable:$true] %s627_s3 }
  0xfc   : > { %s2241_s10 = sld [smem:[#allocation58_spill]]  ;;  %s2242_s8 = scalar_lea.vmem [#allocation9], %s1975_s23 }
  0xfd   : > { %v586_v5 = vld [vmem:[%s2242_s8] sm:$0xff]  ;;  %s2025_s4 = scalar_lea.vmem [#allocation20], %s914_s2  ;;  %s920_s7 = sshll.u32 %s1658_s29, 3 }
  0xfe   : > { %s654_s12 = sshll.u32 %s2025_s4, 4  ;;  %s2243_s27 = sld [smem:[#allocation57_spill]]  ;;  %s2043_s12 = int_to_ptr.vmem [resolvable:$true] %s654_s12 }
  0xff   : > { %s584_s1 = ssub.f32 1.0, %s583_s22  ;;  %v587_v3 = vstv %s583_s22  ;;  %s921_s22 = sshll.u32 %s1658_s29, 1 }
 0x100   : > { %v595_v7 = vmul.f32 %v593_v0, %v587_v3  ;;  %v588_v8 = vmul.f32 %v587_v3, %v585_v1  ;;  %v601_v9 = vmul.f32 %v599_v2, %v587_v3  ;;  %s2245_s21 = sld [smem:[#allocation59_spill]]  ;;  %p2248_p12 = scmp.ne.s32.totalorder %s2217_s16, 0 }
 0x101   : > { %v589_v10 = vstv %s584_s1  ;;  %s611_s1 = scalar_lea.sflag [#allocation19], %s1972_s11 }
 0x102   : > { %s638_s14 = scalar_lea.hbm %s2241_s10, %s1658_s29  ;;  %v596_v11 = vmul.f32 %v594_v4, %v589_v10  ;;  %v590_v12 = vmul.f32 %v589_v10, %v586_v5  ;;  %v602_v13 = vmul.f32 %v600_v6, %v589_v10  ;;  %s2247_s29 = scalar_lea.vmem [#allocation18], %s1959_s15 }
 0x103   : > { %s2028_s24 = sshll.u32 %s638_s14, 4  ;;  %s1328_s23 = scalar_lea.hbm %s2241_s10, 8  ;;  %s643_s24 = int_to_ptr.hbm [resolvable:$true] %s2028_s24 }
 0x104   : > { %s2244_s8 = smov %s2243_s27  ;;  %s625_s0 = scalar_lea.hbm %s2243_s27, %s920_s7  ;;  %v597_v14 = vadd.f32 %v596_v11, %v595_v7  ;;  %v591_v15 = vadd.f32 %v590_v12, %v588_v8  ;;  %v603_v16 = vadd.f32 %v602_v13, %v601_v9 }
 0x105   : > { %s629_s14 = sshll.u32 %s625_s0, 4  ;;  %s1322_s7 = sshra.s32 %s643_s24, 4  ;;  %s2039_s14 = int_to_ptr.hbm [resolvable:$true] %s629_s14  ;;  %s1323_s7 = int_to_ptr.hbm [resolvable:$true] %s1322_s7 }
 0x106   : > { %s2246_s5 = smov %s2245_s21  ;;  %s652_s6 = scalar_lea.hbm %s2245_s21, %s921_s22  ;;  %598 = vst [vmem:[%s2247_s29] sm:$0x1] %v597_v14 }
 0x107   : > { %s656_s26 = sshll.u32 %s652_s6, 4  ;;  %592 = vst [vmem:[%s2012_s13] sm:$0xff] %v591_v15  ;;  %s1324_s21 = scalar_lea.hbm %s1323_s7, 1  ;;  %s2045_s26 = int_to_ptr.hbm [resolvable:$true] %s656_s26 }
 0x108   : > { %p1325_p5 = scmp.ne.s32.totalorder %s1323_s7, %s1324_s21  ;;  %p1329_p4 = scmp.lt.s32.totalorder %s1323_s7, %s2241_s10 }
 0x109   : > { %p1330_p11 = scmp.lt.s32.totalorder %s1328_s23, %s1324_s21 }
 0x10a   : > { %p1326_p3 = pnand %p1325_p5, %p2248_p12 }
 0x10b   : > { %p1331_p7 = por %p1330_p11, %p1329_p4 }
 0x10c   : > { %p1327_p8 = pneg %p1326_p3 }
 0x10e   : > { %p1332_p13 = pnand %p1331_p7, %p1327_p8 }
 0x110   : > { %1335 = shalt.err (!%p1332_p13)
}
 0x111   : > { %s2249_s13 = sld [smem:[#allocation49_spill]]  ;;  %604 = vst [vmem:[%s2025_s4] sm:$0x3] %v603_v16  ;;  %s606_s2 = scalar_lea.sflag [#allocation6], %s1959_s15 }
 0x112   : > { %s1350_s20 = sshra.s32 %s2039_s14, 4  ;;  %s1356_s6 = scalar_lea.hbm %s2244_s8, 64  ;;  %s1351_s20 = int_to_ptr.hbm [resolvable:$true] %s1350_s20 }
 0x113   : > { %s1352_s29 = scalar_lea.hbm %s1351_s20, 8  ;;  %p1357_p1 = scmp.lt.s32.totalorder %s1351_s20, %s2244_s8 }
 0x114   : > { %p1353_p2 = scmp.ne.s32.totalorder %s1351_s20, %s1352_s29  ;;  %p1358_p10 = scmp.lt.s32.totalorder %s1356_s6, %s1352_s29 }
 0x116   : > { %p1354_p6 = pnand %p1353_p2, %p2248_p12  ;;  %p1359_p0 = por %p1358_p10, %p1357_p1 }
 0x117   : > { %s2250_s0 = int_to_ptr.vmem [resolvable:$true] %s2249_s13 }
 0x118   : > { %947 = dma.vmem_to_hbm [thread:$0]  (%p2248_p12), %s2250_s0, 16, %s643_s24, %s611_s1  }
 0x119   : > { %p1355_p9 = pneg %p1354_p6 }
 0x11b   : > { %p1360_p5 = pnand %p1359_p0, %p1355_p9 }
 0x11d   : > { %1363 = shalt.err (!%p1360_p5)
}
 0x11e   : > { %946 = dma.vmem_to_hbm [thread:$0]  (%p2248_p12), %s2023_s3, 128, %s2039_s14, %s606_s2  }
 0x11f   : > { %s1378_s15 = sshra.s32 %s2045_s26, 4  ;;  %s1384_s27 = scalar_lea.hbm %s2246_s5, 16  ;;  %s1379_s15 = int_to_ptr.hbm [resolvable:$true] %s1378_s15 }
 0x120   : > { %s1380_s4 = scalar_lea.hbm %s1379_s15, 2  ;;  %p1385_p11 = scmp.lt.s32.totalorder %s1379_s15, %s2246_s5 }
 0x121   : > { %p1381_p3 = scmp.ne.s32.totalorder %s1379_s15, %s1380_s4  ;;  %p1386_p7 = scmp.lt.s32.totalorder %s1384_s27, %s1380_s4 }
 0x123   : > { %p1382_p8 = pnand %p1381_p3, %p2248_p12  ;;  %p1387_p13 = por %p1386_p7, %p1385_p11 }
 0x125   : > { %p1383_p4 = pneg %p1382_p8 }
 0x127   : > { %p1388_p2 = pnand %p1387_p13, %p1383_p4 }
 0x129   : > { %1391 = shalt.err (!%p1388_p2)
}
 0x12a   : > { %948 = dma.vmem_to_hbm [thread:$0]  (%p2248_p12), %s2043_s12, 32, %s2045_s26, %s611_s1  }
 0x12b PF: > { %s2251_s3 = sld [smem:[#allocation44_spill]]  ;;  %p994_p6 = scmp.ge.s32.totalorder %s1532_s28, 2 }
 0x12c   : > { %s668_s14 = sand.u32 1, %s1520_s25  }
 0x12d   : > { %s669_s2 = scalar_lea.sflag [#allocation6], %s668_s14 }
 0x131   : > { %p2252_p9 = scmp.ne.s32.totalorder %s2251_s3, 0 }
 0x133   : > { %p982_p1 = pnand %p994_p6, %p2252_p9 }
 0x135   : > { %p983_p10 = pneg %p982_p1 }
 0x137   : > { %1475 = dma.done.wait (%p983_p10), %s669_s2, 128  }
 0x138   : > { %1477 = vsyncadd (%p983_p10), %s669_s2, 4294967168  ;;  %s2253_s20 = sadd.s32 4294967294, %s1532_s28  }
 0x139   : > { %s678_s16 = sand.u32 1, %s2253_s20  }
 0x13a   : > { %s679_s29 = scalar_lea.sflag [#allocation19], %s678_s16 }
 0x13b   : > { %1479 = dma.done.wait (%p983_p10), %s679_s29, 48  }
 0x13c   : > { %1481 = vsyncadd (%p983_p10), %s679_s29, 4294967248  ;;  %s2254_s19 = sld [smem:[#allocation37_spill]]  ;;  %p45_p12 = scmp.ge.s32.totalorder %s1661_s30, 10  }
 0x13d   : > { %s2255_s20 = sld [smem:[#allocation38_spill]]  ;;  %s2263_s0 = smov %s1488_s17 }
 0x13e   : > { %s2256_s21 = sld [smem:[#allocation47_spill]]  ;;  %s2264_s17 = smov %s1492_s18 }
 0x13f   : > { %s2257_s22 = sld [smem:[#allocation39_spill]]  ;;  %s2265_s18 = smov %s1932_s9 }
 0x140   : > { %s2258_s23 = sld [smem:[#allocation40_spill]]  ;;  %s2266_s28 = smov %s1661_s30 }
 0x141   : > { %s2259_s24 = sld [smem:[#allocation45_spill]]  ;;  %47 = sbr.rel (!%p45_p12) target bundleno = 34 (0x22), region = 191 }
 0x142   : > { %s2260_s25 = sld [smem:[#allocation41_spill]] }
 0x143   : > { %s2261_s26 = sld [smem:[#allocation42_spill]] }
 0x144   : > { %s2262_s27 = sld [smem:[#allocation48_spill]] }
 0x146   :  { %694 = vsyncpa [#allocation5], 1 }
 0x147   :  { %696 = vsyncpa [#allocation5 + $0x1], 1 }
 0x148   :  { %697 = vsyncpa [#allocation10], 1 }
 0x149   :  { %699 = vsyncpa [#allocation10 + $0x1], 1 }
 0x14a   :  { %700 = vsyncpa [#allocation13], 1 }
 0x14b   :  { %702 = vsyncpa [#allocation13 + $0x1], 1 }
 0x14c   :  { %703 = vsyncpa [#allocation16], 1 }
 0x14d   :  { %705 = vsyncpa [#allocation16 + $0x1], 1 }
 0x14e   :  { %706 = vsyncpa [#allocation6], 1 }
 0x14f   :  { %708 = vsyncpa [#allocation6 + $0x1], 1 }
 0x150   :  { %709 = vsyncpa [#allocation19], 1 }
 0x151   :  { %711 = vsyncpa [#allocation19 + $0x1], 1 }
 0x152   :  { %712 = vsyncpa [#allocation7], 1 }
 0x153   :  { %714 = vsyncpa [#allocation7 + $0x1], 1 }

</bundles_post_ra>
